<compile_context>
chip_gen: v5e
topology: v5e:2x2
jax: 0.10.0
libtpu: 0.0.40
codegen_flags: <defaults>
</compile_context>

<pallas_src>
from functools import partial

import jax
import jax.numpy as jnp
import numpy as np
from jax.experimental import pallas as pl
from jax.experimental.pallas import tpu as pltpu

# ----------------------------- small Persimmon-like config -----------------------------
B, S = 2, 8                       # batch, seq_len
HIDDEN = 64                       # config.hidden_size
NUM_HEADS = 4                     # config.num_attention_heads
HEAD_DIM = HIDDEN // NUM_HEADS    # 16
PARTIAL_ROTARY_FACTOR = 0.5       # config.partial_rotary_factor
ROT = int(HEAD_DIM * PARTIAL_ROTARY_FACTOR)   # rotary_ndims = 8
ROPE_THETA = 10000.0              # config.rope_theta
LN_EPS = 1e-5                     # config.layer_norm_eps
SCALING = HEAD_DIM ** -0.5
QK_LAYERNORM = True               # config.qk_layernorm (Persimmon default)


# ----------------------------- fused Pallas kernel (one program per batch) -----------------------------
def _persimmon_attn_kernel(x_ref, wqkv_ref, wdense_ref, prm_ref, cs_ref, mats_ref,
                           *rest, seq, hidden, heads, head_dim, scaling, eps,
                           qk_layernorm, has_mask):
    if has_mask:
        mask_ref, o_ref = rest
    else:
        (o_ref,) = rest

    f32 = jnp.float32
    x = x_ref[...]                              # [S, HIDDEN]

    # ---- packed small params: one [8, HIDDEN] slab (single vreg, single DMA) ----
    prm = prm_ref[...]
    bq, bk, bv = prm[0:1, :], prm[1:2, :], prm[2:3, :]
    bd = prm[3:4, :]
    qg, qb = prm[4:5, :], prm[5:6, :]
    kg, kb = prm[6:7, :], prm[7:8, :]

    cos = cs_ref[0]                             # [S, HIDDEN] (per-head tiled, ones past ROT)
    sin = cs_ref[1]                             # [S, HIDDEN] (per-head tiled, zeros past ROT)
    rotm = mats_ref[0]                          # [HIDDEN, HIDDEN] block-diag rotate-half
    avgm = mats_ref[1]                          # [HIDDEN, HIDDEN] block-diag 1/head_dim averaging

    # ---- QKV projection: three slab matmuls via leading-dim ref indexing ----
    q = jnp.dot(x, wqkv_ref[0], preferred_element_type=f32) + bq   # [S, H*D]
    k = jnp.dot(x, wqkv_ref[1], preferred_element_type=f32) + bk
    v = jnp.dot(x, wqkv_ref[2], preferred_element_type=f32) + bv

    # ---- per-head LayerNorm computed on the whole slab (block-averaging matmul) ----
    if qk_layernorm:
        def _ln_slab(t, g, b):
            mu = jnp.dot(t, avgm, preferred_element_type=f32)       # per-head mean, broadcast
            tc = t - mu
            var = jnp.dot(tc * tc, avgm, preferred_element_type=f32)
            return tc * jax.lax.rsqrt(var + eps) * g + b
        q = _ln_slab(q, qg, qb)
        k = _ln_slab(k, kg, kb)

    # ---- partial RoPE on the whole slab (block-diag rotate-half matmul) ----
    def _rope_slab(t):
        return t * cos + jnp.dot(t, rotm, preferred_element_type=f32) * sin

    q = _rope_slab(q) * scaling
    k = _rope_slab(k)

    if has_mask:
        mask = mask_ref[...]                     # [S, S] additive mask (same semantics as reference)

    wd = wdense_ref[...]                         # [H*D, HIDDEN]

    # ---- per-head attention; dense projection folded per head (lane-dense accumulation) ----
    out = jnp.zeros((seq, hidden), f32)
    for h in range(heads):                       # tiny static loop (4 heads)
        lo, hi = h * head_dim, (h + 1) * head_dim
        qh, kh, vh = q[:, lo:hi], k[:, lo:hi], v[:, lo:hi]

        s = jax.lax.dot_general(qh, kh, (((1,), (1,)), ((), ())),
                                preferred_element_type=f32)          # [S, S] (already scaled)
        if has_mask:
            s = s + mask
        s = s - jnp.max(s, axis=-1, keepdims=True)
        p = jnp.exp(s)
        p = p / jnp.sum(p, axis=-1, keepdims=True)                   # exact reciprocal

        ctx = jnp.dot(p, vh, preferred_element_type=f32)             # [S, D]
        out = out + jnp.dot(ctx, wd[lo:hi, :], preferred_element_type=f32)

    o_ref[...] = (out + bd).astype(o_ref.dtype)


# ----------------------------- wrapper glue (weight/table prep only) -----------------------------
def rotary_cos_sin(seq):
    """PersimmonRotaryEmbedding (default rope type, attention_scaling = 1.0) -> [S, ROT]."""
    inv_freq = 1.0 / (ROPE_THETA ** (jnp.arange(0, ROT, 2, dtype=jnp.float32) / ROT))
    pos = jnp.arange(seq, dtype=jnp.float32)
    freqs = pos[:, None] * inv_freq[None, :]              # [S, ROT//2]
    emb = jnp.concatenate([freqs, freqs], axis=-1)        # [S, ROT]
    return jnp.cos(emb), jnp.sin(emb)


def _rotate_half_matrix(head_dim, rot):
    """R such that (x @ R)[:, :rot] == rotate_half(x[:, :rot]) and zeros past rot."""
    half = rot // 2
    m = np.zeros((head_dim, head_dim), np.float32)
    for j in range(half):
        m[j + half, j] = -1.0      # out[:, j] = -x[:, j + half]
    for j in range(half, rot):
        m[j - half, j] = 1.0       # out[:, j] =  x[:, j - half]
    return m


def _build_static_operands(q_len, params):
    # regroup Persimmon's interleaved QKV columns [(h,q),(h,k),(h,v),...] into
    # [3, HIDDEN, HIDDEN] with head-major columns per q/k/v matrix.
    w = params["w_qkv"].reshape(HIDDEN, NUM_HEADS, 3, HEAD_DIM)
    wqkv3 = jnp.transpose(w, (2, 0, 1, 3)).reshape(3, HIDDEN, HIDDEN)
    b = params["b_qkv"].reshape(NUM_HEADS, 3, HEAD_DIM)
    bqkv3 = jnp.transpose(b, (1, 0, 2)).reshape(3, HIDDEN)

    # all 1-row vector params packed into a single [8, HIDDEN] slab
    tile_h = lambda t: jnp.tile(jnp.reshape(t, (HEAD_DIM,)), (NUM_HEADS,))
    prm = jnp.stack([
        bqkv3[0], bqkv3[1], bqkv3[2], params["b_dense"].reshape(HIDDEN),
        tile_h(params["q_ln_g"]), tile_h(params["q_ln_b"]),
        tile_h(params["k_ln_g"]), tile_h(params["k_ln_b"]),
    ], axis=0)                                            # [8, HIDDEN]

    # partial-RoPE tables: pad to HEAD_DIM (cos->1, sin->0), tile per head -> [S, HIDDEN]
    cos, sin = rotary_cos_sin(q_len)                      # [S, ROT]
    pad1 = jnp.ones((q_len, HEAD_DIM - ROT), jnp.float32)
    pad0 = jnp.zeros((q_len, HEAD_DIM - ROT), jnp.float32)
    cos_f = jnp.tile(jnp.concatenate([cos, pad1], -1), (1, NUM_HEADS))
    sin_f = jnp.tile(jnp.concatenate([sin, pad0], -1), (1, NUM_HEADS))
    cossin = jnp.stack([cos_f, sin_f], axis=0)            # [2, S, HIDDEN]

    # block-diagonal rotate-half and per-head block-averaging matrices
    rot_bd = np.kron(np.eye(NUM_HEADS, dtype=np.float32),
                     _rotate_half_matrix(HEAD_DIM, ROT))
    avg_bd = np.kron(np.eye(NUM_HEADS, dtype=np.float32),
                     np.full((HEAD_DIM, HEAD_DIM), 1.0 / HEAD_DIM, np.float32))
    mats = jnp.asarray(np.stack([rot_bd, avg_bd], axis=0))  # [2, HIDDEN, HIDDEN]
    return wqkv3, prm, cossin, mats


def persimmon_attention_forward(hidden_states, attention_mask, params):
    # TODO(synk): KV-cache update (past_key_value), training-mode attention dropout
    # and returning attn_weights are not implemented in the Pallas kernel.
    bsz, q_len, _ = hidden_states.shape
    wqkv3, prm, cossin, mats = _build_static_operands(q_len, params)
    has_mask = attention_mask is not None

    kernel = partial(_persimmon_attn_kernel, seq=q_len, hidden=HIDDEN,
                     heads=NUM_HEADS, head_dim=HEAD_DIM, scaling=SCALING,
                     eps=LN_EPS, qk_layernorm=QK_LAYERNORM, has_mask=has_mask)

    in_specs = [
        pl.BlockSpec((None, q_len, HIDDEN), lambda b: (b, 0, 0)),   # x (one batch per program)
        pl.BlockSpec((3, HIDDEN, HIDDEN), lambda b: (0, 0, 0)),     # qkv weight (fetched once)
        pl.BlockSpec((HIDDEN, HIDDEN), lambda b: (0, 0)),           # dense weight
        pl.BlockSpec((8, HIDDEN), lambda b: (0, 0)),                # packed biases + LN params
        pl.BlockSpec((2, q_len, HIDDEN), lambda b: (0, 0, 0)),      # cos/sin (not tiled over batch)
        pl.BlockSpec((2, HIDDEN, HIDDEN), lambda b: (0, 0, 0)),     # rotate-half + averaging mats
    ]
    args = [hidden_states, wqkv3, params["w_dense"], prm, cossin, mats]
    if has_mask:
        in_specs.append(pl.BlockSpec((None, None, q_len, q_len),
                                     lambda b: (b, 0, 0, 0)))       # additive mask per batch
        args.append(attention_mask.astype(jnp.float32))

    out = pl.pallas_call(
        kernel,
        out_shape=jax.ShapeDtypeStruct((bsz, q_len, HIDDEN), jnp.float32),
        grid=(bsz,),
        in_specs=in_specs,
        out_specs=pl.BlockSpec((None, q_len, HIDDEN), lambda b: (b, 0, 0)),
        compiler_params=pltpu.CompilerParams(
            dimension_semantics=("parallel",)),      # batches independent -> both v7x TCs usable
    )(*args)
    return out


# ----------------------------- pure-JAX reference (PyTorch semantics) -----------------------------
def reference_forward(hidden_states, attention_mask, params):
    fused = hidden_states @ params["w_qkv"] + params["b_qkv"]
    fused = fused.reshape(B, S, NUM_HEADS, 3, HEAD_DIM)
    q, k, v = fused[..., 0, :], fused[..., 1, :], fused[..., 2, :]

    def _ln(t, g, b):
        mu = t.mean(-1, keepdims=True)
        var = ((t - mu) ** 2).mean(-1, keepdims=True)
        return (t - mu) / jnp.sqrt(var + LN_EPS) * g + b

    if QK_LAYERNORM:
        q = _ln(q, params["q_ln_g"], params["q_ln_b"])
        k = _ln(k, params["k_ln_g"], params["k_ln_b"])

    q = q.transpose(0, 2, 1, 3)
    k = k.transpose(0, 2, 1, 3)
    v = v.transpose(0, 2, 1, 3)

    cos, sin = rotary_cos_sin(S)
    cos_ = jnp.broadcast_to(cos, (B, S, ROT))[:, None]   # unsqueeze_dim=1
    sin_ = jnp.broadcast_to(sin, (B, S, ROT))[:, None]

    def _rope(t):
        tr, tp = t[..., :ROT], t[..., ROT:]
        x1, x2 = tr[..., : ROT // 2], tr[..., ROT // 2:]
        tr = tr * cos_ + jnp.concatenate([-x2, x1], -1) * sin_
        return jnp.concatenate([tr, tp], -1)

    q, k = _rope(q), _rope(k)

    scores = jnp.einsum("bhqd,bhkd->bhqk", q, k) * SCALING + attention_mask
    p = jax.nn.softmax(scores.astype(jnp.float32), axis=-1)
    o = jnp.einsum("bhqk,bhkd->bhqd", p, v)
    o = o.transpose(0, 2, 1, 3).reshape(B, S, HIDDEN)
    return o @ params["w_dense"] + params["b_dense"]


# ----------------------------- main -----------------------------
if __name__ == "__main__":
    key = jax.random.PRNGKey(0)
    ks = jax.random.split(key, 10)

    params = {
        "w_qkv": 0.05 * jax.random.normal(ks[0], (HIDDEN, 3 * HIDDEN), jnp.float32),
        "b_qkv": 0.05 * jax.random.normal(ks[1], (3 * HIDDEN,), jnp.float32),
        "w_dense": 0.05 * jax.random.normal(ks[2], (HIDDEN, HIDDEN), jnp.float32),
        "b_dense": 0.05 * jax.random.normal(ks[3], (HIDDEN,), jnp.float32),
        "q_ln_g": (1.0 + 0.1 * jax.random.normal(ks[4], (1, HEAD_DIM), jnp.float32)),
        "q_ln_b": 0.1 * jax.random.normal(ks[5], (1, HEAD_DIM), jnp.float32),
        "k_ln_g": (1.0 + 0.1 * jax.random.normal(ks[6], (1, HEAD_DIM), jnp.float32)),
        "k_ln_b": 0.1 * jax.random.normal(ks[7], (1, HEAD_DIM), jnp.float32),
    }

    hidden_states = jax.random.normal(ks[8], (B, S, HIDDEN), jnp.float32)

    # additive causal mask [B, 1, S, S] (what the Persimmon model feeds eager attention)
    idx = jnp.arange(S)
    causal = idx[None, :] <= idx[:, None]
    mask = jnp.where(causal, 0.0, jnp.finfo(jnp.float32).min).astype(jnp.float32)
    attention_mask = jnp.broadcast_to(mask, (B, 1, S, S))

    out = persimmon_attention_forward(hidden_states, attention_mask, params)
    out = jax.block_until_ready(out)

    ref = reference_forward(hidden_states, attention_mask, params)
    np.testing.assert_allclose(np.asarray(out), np.asarray(ref), rtol=2e-3, atol=2e-3)

    print("KERNEL_OK")
</pallas_src>

<mosaic_0001>
module attributes {stable_mosaic.version = 11 : i64} {
  func.func @_persimmon_attn_kernel(%arg0: i32, %arg1: memref<1x8x64xf32, #tpu.memory_space<vmem>>, %arg2: memref<3x64x64xf32, #tpu.memory_space<vmem>>, %arg3: memref<64x64xf32, #tpu.memory_space<vmem>>, %arg4: memref<8x64xf32, #tpu.memory_space<vmem>>, %arg5: memref<2x8x64xf32, #tpu.memory_space<vmem>>, %arg6: memref<2x64x64xf32, #tpu.memory_space<vmem>>, %arg7: memref<1x1x8x8xf32, #tpu.memory_space<vmem>>, %arg8: memref<1x8x64xf32, #tpu.memory_space<vmem>>) attributes {dimension_semantics = [#tpu.dimension_semantics<parallel>], iteration_bounds = array<i64: 2>, scalar_prefetch = 0 : i64, scratch_operands = 0 : i64, tpu.core_type = #tpu.core_type<tc>, window_params = [{transform_indices = @transform_0, window_bounds = array<i64: 1, 8, 64>}, {pipeline_mode = #tpu.pipeline_mode<synchronous>, transform_indices = @transform_1, window_bounds = array<i64: 3, 64, 64>}, {pipeline_mode = #tpu.pipeline_mode<synchronous>, transform_indices = @transform_2, window_bounds = array<i64: 64, 64>}, {pipeline_mode = #tpu.pipeline_mode<synchronous>, transform_indices = @transform_3, window_bounds = array<i64: 8, 64>}, {pipeline_mode = #tpu.pipeline_mode<synchronous>, transform_indices = @transform_4, window_bounds = array<i64: 2, 8, 64>}, {pipeline_mode = #tpu.pipeline_mode<synchronous>, transform_indices = @transform_5, window_bounds = array<i64: 2, 64, 64>}, {transform_indices = @transform_6, window_bounds = array<i64: 1, 1, 8, 8>}, {transform_indices = @transform_7, window_bounds = array<i64: 1, 8, 64>}]} {
    %c0 = arith.constant 0 : index
    %c0_0 = arith.constant 0 : index
    %c0_1 = arith.constant 0 : index
    %0 = vector.load %arg1[%c0, %c0_0, %c0_1] : memref<1x8x64xf32, #tpu.memory_space<vmem>>, vector<1x8x64xf32>
    %1 = vector.shape_cast %0 : vector<1x8x64xf32> to vector<8x64xf32>
    %c0_2 = arith.constant 0 : index
    %c0_3 = arith.constant 0 : index
    %2 = vector.load %arg4[%c0_2, %c0_3] : memref<8x64xf32, #tpu.memory_space<vmem>>, vector<8x64xf32>
    %3 = vector.extract_strided_slice %2 {offsets = [0, 0], sizes = [1, 64], strides = [1, 1]} : vector<8x64xf32> to vector<1x64xf32>
    %4 = vector.extract_strided_slice %2 {offsets = [1, 0], sizes = [1, 64], strides = [1, 1]} : vector<8x64xf32> to vector<1x64xf32>
    %5 = vector.extract_strided_slice %2 {offsets = [2, 0], sizes = [1, 64], strides = [1, 1]} : vector<8x64xf32> to vector<1x64xf32>
    %6 = vector.extract_strided_slice %2 {offsets = [3, 0], sizes = [1, 64], strides = [1, 1]} : vector<8x64xf32> to vector<1x64xf32>
    %7 = vector.extract_strided_slice %2 {offsets = [4, 0], sizes = [1, 64], strides = [1, 1]} : vector<8x64xf32> to vector<1x64xf32>
    %8 = vector.extract_strided_slice %2 {offsets = [5, 0], sizes = [1, 64], strides = [1, 1]} : vector<8x64xf32> to vector<1x64xf32>
    %9 = vector.extract_strided_slice %2 {offsets = [6, 0], sizes = [1, 64], strides = [1, 1]} : vector<8x64xf32> to vector<1x64xf32>
    %10 = vector.extract_strided_slice %2 {offsets = [7, 0], sizes = [1, 64], strides = [1, 1]} : vector<8x64xf32> to vector<1x64xf32>
    %c0_4 = arith.constant 0 : index
    %c0_5 = arith.constant 0 : index
    %c0_6 = arith.constant 0 : index
    %11 = vector.load %arg5[%c0_4, %c0_5, %c0_6] : memref<2x8x64xf32, #tpu.memory_space<vmem>>, vector<1x8x64xf32>
    %12 = vector.shape_cast %11 : vector<1x8x64xf32> to vector<8x64xf32>
    %c1 = arith.constant 1 : index
    %c0_7 = arith.constant 0 : index
    %c0_8 = arith.constant 0 : index
    %13 = vector.load %arg5[%c1, %c0_7, %c0_8] : memref<2x8x64xf32, #tpu.memory_space<vmem>>, vector<1x8x64xf32>
    %14 = vector.shape_cast %13 : vector<1x8x64xf32> to vector<8x64xf32>
    %c0_9 = arith.constant 0 : index
    %c0_10 = arith.constant 0 : index
    %c0_11 = arith.constant 0 : index
    %15 = vector.load %arg6[%c0_9, %c0_10, %c0_11] : memref<2x64x64xf32, #tpu.memory_space<vmem>>, vector<1x64x64xf32>
    %16 = vector.shape_cast %15 : vector<1x64x64xf32> to vector<64x64xf32>
    %c1_12 = arith.constant 1 : index
    %c0_13 = arith.constant 0 : index
    %c0_14 = arith.constant 0 : index
    %17 = vector.load %arg6[%c1_12, %c0_13, %c0_14] : memref<2x64x64xf32, #tpu.memory_space<vmem>>, vector<1x64x64xf32>
    %18 = vector.shape_cast %17 : vector<1x64x64xf32> to vector<64x64xf32>
    %c0_15 = arith.constant 0 : index
    %c0_16 = arith.constant 0 : index
    %c0_17 = arith.constant 0 : index
    %19 = vector.load %arg2[%c0_15, %c0_16, %c0_17] : memref<3x64x64xf32, #tpu.memory_space<vmem>>, vector<1x64x64xf32>
    %20 = vector.shape_cast %19 : vector<1x64x64xf32> to vector<64x64xf32>
    %cst = arith.constant dense<0.000000e+00> : vector<8x64xf32>
    %21 = tpu.matmul %1, %20, %cst {dimension_numbers = #tpu.dot_dimension_numbers<[1], [0], [0], [1], [0, 0, 1, 1], [], []>} : vector<8x64xf32>, vector<64x64xf32>, vector<8x64xf32> -> vector<8x64xf32>
    %22 = vector.broadcast %3 : vector<1x64xf32> to vector<8x64xf32>
    %23 = arith.addf %21, %22 : vector<8x64xf32>
    %c1_18 = arith.constant 1 : index
    %c0_19 = arith.constant 0 : index
    %c0_20 = arith.constant 0 : index
    %24 = vector.load %arg2[%c1_18, %c0_19, %c0_20] : memref<3x64x64xf32, #tpu.memory_space<vmem>>, vector<1x64x64xf32>
    %25 = vector.shape_cast %24 : vector<1x64x64xf32> to vector<64x64xf32>
    %cst_21 = arith.constant dense<0.000000e+00> : vector<8x64xf32>
    %26 = tpu.matmul %1, %25, %cst_21 {dimension_numbers = #tpu.dot_dimension_numbers<[1], [0], [0], [1], [0, 0, 1, 1], [], []>} : vector<8x64xf32>, vector<64x64xf32>, vector<8x64xf32> -> vector<8x64xf32>
    %27 = vector.broadcast %4 : vector<1x64xf32> to vector<8x64xf32>
    %28 = arith.addf %26, %27 : vector<8x64xf32>
    %c2 = arith.constant 2 : index
    %c0_22 = arith.constant 0 : index
    %c0_23 = arith.constant 0 : index
    %29 = vector.load %arg2[%c2, %c0_22, %c0_23] : memref<3x64x64xf32, #tpu.memory_space<vmem>>, vector<1x64x64xf32>
    %30 = vector.shape_cast %29 : vector<1x64x64xf32> to vector<64x64xf32>
    %cst_24 = arith.constant dense<0.000000e+00> : vector<8x64xf32>
    %31 = tpu.matmul %1, %30, %cst_24 {dimension_numbers = #tpu.dot_dimension_numbers<[1], [0], [0], [1], [0, 0, 1, 1], [], []>} : vector<8x64xf32>, vector<64x64xf32>, vector<8x64xf32> -> vector<8x64xf32>
    %32 = vector.broadcast %5 : vector<1x64xf32> to vector<8x64xf32>
    %33 = arith.addf %31, %32 : vector<8x64xf32>
    %cst_25 = arith.constant dense<0.000000e+00> : vector<8x64xf32>
    %34 = tpu.matmul %23, %18, %cst_25 {dimension_numbers = #tpu.dot_dimension_numbers<[1], [0], [0], [1], [0, 0, 1, 1], [], []>} : vector<8x64xf32>, vector<64x64xf32>, vector<8x64xf32> -> vector<8x64xf32>
    %35 = arith.subf %23, %34 : vector<8x64xf32>
    %36 = arith.mulf %35, %35 : vector<8x64xf32>
    %cst_26 = arith.constant dense<0.000000e+00> : vector<8x64xf32>
    %37 = tpu.matmul %36, %18, %cst_26 {dimension_numbers = #tpu.dot_dimension_numbers<[1], [0], [0], [1], [0, 0, 1, 1], [], []>} : vector<8x64xf32>, vector<64x64xf32>, vector<8x64xf32> -> vector<8x64xf32>
    %cst_27 = arith.constant 9.99999974E-6 : f32
    %38 = vector.broadcast %cst_27 : f32 to vector<8x64xf32>
    %39 = arith.addf %37, %38 : vector<8x64xf32>
    %40 = math.rsqrt %39 : vector<8x64xf32>
    %41 = arith.mulf %35, %40 : vector<8x64xf32>
    %42 = vector.broadcast %7 : vector<1x64xf32> to vector<8x64xf32>
    %43 = arith.mulf %41, %42 : vector<8x64xf32>
    %44 = vector.broadcast %8 : vector<1x64xf32> to vector<8x64xf32>
    %45 = arith.addf %43, %44 : vector<8x64xf32>
    %cst_28 = arith.constant dense<0.000000e+00> : vector<8x64xf32>
    %46 = tpu.matmul %28, %18, %cst_28 {dimension_numbers = #tpu.dot_dimension_numbers<[1], [0], [0], [1], [0, 0, 1, 1], [], []>} : vector<8x64xf32>, vector<64x64xf32>, vector<8x64xf32> -> vector<8x64xf32>
    %47 = arith.subf %28, %46 : vector<8x64xf32>
    %48 = arith.mulf %47, %47 : vector<8x64xf32>
    %cst_29 = arith.constant dense<0.000000e+00> : vector<8x64xf32>
    %49 = tpu.matmul %48, %18, %cst_29 {dimension_numbers = #tpu.dot_dimension_numbers<[1], [0], [0], [1], [0, 0, 1, 1], [], []>} : vector<8x64xf32>, vector<64x64xf32>, vector<8x64xf32> -> vector<8x64xf32>
    %cst_30 = arith.constant 9.99999974E-6 : f32
    %50 = vector.broadcast %cst_30 : f32 to vector<8x64xf32>
    %51 = arith.addf %49, %50 : vector<8x64xf32>
    %52 = math.rsqrt %51 : vector<8x64xf32>
    %53 = arith.mulf %47, %52 : vector<8x64xf32>
    %54 = vector.broadcast %9 : vector<1x64xf32> to vector<8x64xf32>
    %55 = arith.mulf %53, %54 : vector<8x64xf32>
    %56 = vector.broadcast %10 : vector<1x64xf32> to vector<8x64xf32>
    %57 = arith.addf %55, %56 : vector<8x64xf32>
    %58 = arith.mulf %45, %12 : vector<8x64xf32>
    %cst_31 = arith.constant dense<0.000000e+00> : vector<8x64xf32>
    %59 = tpu.matmul %45, %16, %cst_31 {dimension_numbers = #tpu.dot_dimension_numbers<[1], [0], [0], [1], [0, 0, 1, 1], [], []>} : vector<8x64xf32>, vector<64x64xf32>, vector<8x64xf32> -> vector<8x64xf32>
    %60 = arith.mulf %59, %14 : vector<8x64xf32>
    %61 = arith.addf %58, %60 : vector<8x64xf32>
    %cst_32 = arith.constant 2.500000e-01 : f32
    %62 = vector.broadcast %cst_32 : f32 to vector<8x64xf32>
    %63 = arith.mulf %61, %62 : vector<8x64xf32>
    %64 = arith.mulf %57, %12 : vector<8x64xf32>
    %cst_33 = arith.constant dense<0.000000e+00> : vector<8x64xf32>
    %65 = tpu.matmul %57, %16, %cst_33 {dimension_numbers = #tpu.dot_dimension_numbers<[1], [0], [0], [1], [0, 0, 1, 1], [], []>} : vector<8x64xf32>, vector<64x64xf32>, vector<8x64xf32> -> vector<8x64xf32>
    %66 = arith.mulf %65, %14 : vector<8x64xf32>
    %67 = arith.addf %64, %66 : vector<8x64xf32>
    %c0_34 = arith.constant 0 : index
    %c0_35 = arith.constant 0 : index
    %c0_36 = arith.constant 0 : index
    %c0_37 = arith.constant 0 : index
    %68 = vector.load %arg7[%c0_34, %c0_35, %c0_36, %c0_37] : memref<1x1x8x8xf32, #tpu.memory_space<vmem>>, vector<1x1x8x8xf32>
    %69 = vector.shape_cast %68 : vector<1x1x8x8xf32> to vector<8x8xf32>
    %c0_38 = arith.constant 0 : index
    %c0_39 = arith.constant 0 : index
    %70 = vector.load %arg3[%c0_38, %c0_39] : memref<64x64xf32, #tpu.memory_space<vmem>>, vector<64x64xf32>
    %cst_40 = arith.constant 0.000000e+00 : f32
    %71 = vector.broadcast %cst_40 : f32 to vector<8x64xf32>
    %72 = vector.extract_strided_slice %63 {offsets = [0, 0], sizes = [8, 16], strides = [1, 1]} : vector<8x64xf32> to vector<8x16xf32>
    %73 = vector.extract_strided_slice %67 {offsets = [0, 0], sizes = [8, 16], strides = [1, 1]} : vector<8x64xf32> to vector<8x16xf32>
    %74 = vector.extract_strided_slice %33 {offsets = [0, 0], sizes = [8, 16], strides = [1, 1]} : vector<8x64xf32> to vector<8x16xf32>
    %cst_41 = arith.constant dense<0.000000e+00> : vector<8x8xf32>
    %75 = tpu.matmul %72, %73, %cst_41 {dimension_numbers = #tpu.dot_dimension_numbers<[1], [1], [0], [0], [0, 0, 1, 0], [], []>} : vector<8x16xf32>, vector<8x16xf32>, vector<8x8xf32> -> vector<8x8xf32>
    %76 = arith.addf %75, %69 : vector<8x8xf32>
    %cst_42 = arith.constant dense<0xFF800000> : vector<8xf32>
    %77 = vector.multi_reduction <maximumf>, %76, %cst_42 [1] : vector<8x8xf32> to vector<8xf32>
    %78 = vector.shape_cast %77 : vector<8xf32> to vector<8x1xf32>
    %79 = vector.broadcast %78 : vector<8x1xf32> to vector<8x8xf32>
    %80 = arith.subf %76, %79 : vector<8x8xf32>
    %81 = math.exp %80 : vector<8x8xf32>
    %cst_43 = arith.constant dense<0.000000e+00> : vector<8xf32>
    %82 = vector.multi_reduction <add>, %81, %cst_43 [1] : vector<8x8xf32> to vector<8xf32>
    %83 = vector.shape_cast %82 : vector<8xf32> to vector<8x1xf32>
    %84 = vector.broadcast %83 : vector<8x1xf32> to vector<8x8xf32>
    %85 = arith.divf %81, %84 : vector<8x8xf32>
    %cst_44 = arith.constant dense<0.000000e+00> : vector<8x16xf32>
    %86 = tpu.matmul %85, %74, %cst_44 {dimension_numbers = #tpu.dot_dimension_numbers<[1], [0], [0], [1], [0, 0, 1, 1], [], []>} : vector<8x8xf32>, vector<8x16xf32>, vector<8x16xf32> -> vector<8x16xf32>
    %87 = vector.extract_strided_slice %70 {offsets = [0, 0], sizes = [16, 64], strides = [1, 1]} : vector<64x64xf32> to vector<16x64xf32>
    %cst_45 = arith.constant dense<0.000000e+00> : vector<8x64xf32>
    %88 = tpu.matmul %86, %87, %cst_45 {dimension_numbers = #tpu.dot_dimension_numbers<[1], [0], [0], [1], [0, 0, 1, 1], [], []>} : vector<8x16xf32>, vector<16x64xf32>, vector<8x64xf32> -> vector<8x64xf32>
    %89 = arith.addf %71, %88 : vector<8x64xf32>
    %90 = vector.extract_strided_slice %63 {offsets = [0, 16], sizes = [8, 16], strides = [1, 1]} : vector<8x64xf32> to vector<8x16xf32>
    %91 = vector.extract_strided_slice %67 {offsets = [0, 16], sizes = [8, 16], strides = [1, 1]} : vector<8x64xf32> to vector<8x16xf32>
    %92 = vector.extract_strided_slice %33 {offsets = [0, 16], sizes = [8, 16], strides = [1, 1]} : vector<8x64xf32> to vector<8x16xf32>
    %cst_46 = arith.constant dense<0.000000e+00> : vector<8x8xf32>
    %93 = tpu.matmul %90, %91, %cst_46 {dimension_numbers = #tpu.dot_dimension_numbers<[1], [1], [0], [0], [0, 0, 1, 0], [], []>} : vector<8x16xf32>, vector<8x16xf32>, vector<8x8xf32> -> vector<8x8xf32>
    %94 = arith.addf %93, %69 : vector<8x8xf32>
    %cst_47 = arith.constant dense<0xFF800000> : vector<8xf32>
    %95 = vector.multi_reduction <maximumf>, %94, %cst_47 [1] : vector<8x8xf32> to vector<8xf32>
    %96 = vector.shape_cast %95 : vector<8xf32> to vector<8x1xf32>
    %97 = vector.broadcast %96 : vector<8x1xf32> to vector<8x8xf32>
    %98 = arith.subf %94, %97 : vector<8x8xf32>
    %99 = math.exp %98 : vector<8x8xf32>
    %cst_48 = arith.constant dense<0.000000e+00> : vector<8xf32>
    %100 = vector.multi_reduction <add>, %99, %cst_48 [1] : vector<8x8xf32> to vector<8xf32>
    %101 = vector.shape_cast %100 : vector<8xf32> to vector<8x1xf32>
    %102 = vector.broadcast %101 : vector<8x1xf32> to vector<8x8xf32>
    %103 = arith.divf %99, %102 : vector<8x8xf32>
    %cst_49 = arith.constant dense<0.000000e+00> : vector<8x16xf32>
    %104 = tpu.matmul %103, %92, %cst_49 {dimension_numbers = #tpu.dot_dimension_numbers<[1], [0], [0], [1], [0, 0, 1, 1], [], []>} : vector<8x8xf32>, vector<8x16xf32>, vector<8x16xf32> -> vector<8x16xf32>
    %105 = vector.extract_strided_slice %70 {offsets = [16, 0], sizes = [16, 64], strides = [1, 1]} : vector<64x64xf32> to vector<16x64xf32>
    %cst_50 = arith.constant dense<0.000000e+00> : vector<8x64xf32>
    %106 = tpu.matmul %104, %105, %cst_50 {dimension_numbers = #tpu.dot_dimension_numbers<[1], [0], [0], [1], [0, 0, 1, 1], [], []>} : vector<8x16xf32>, vector<16x64xf32>, vector<8x64xf32> -> vector<8x64xf32>
    %107 = arith.addf %89, %106 : vector<8x64xf32>
    %108 = vector.extract_strided_slice %63 {offsets = [0, 32], sizes = [8, 16], strides = [1, 1]} : vector<8x64xf32> to vector<8x16xf32>
    %109 = vector.extract_strided_slice %67 {offsets = [0, 32], sizes = [8, 16], strides = [1, 1]} : vector<8x64xf32> to vector<8x16xf32>
    %110 = vector.extract_strided_slice %33 {offsets = [0, 32], sizes = [8, 16], strides = [1, 1]} : vector<8x64xf32> to vector<8x16xf32>
    %cst_51 = arith.constant dense<0.000000e+00> : vector<8x8xf32>
    %111 = tpu.matmul %108, %109, %cst_51 {dimension_numbers = #tpu.dot_dimension_numbers<[1], [1], [0], [0], [0, 0, 1, 0], [], []>} : vector<8x16xf32>, vector<8x16xf32>, vector<8x8xf32> -> vector<8x8xf32>
    %112 = arith.addf %111, %69 : vector<8x8xf32>
    %cst_52 = arith.constant dense<0xFF800000> : vector<8xf32>
    %113 = vector.multi_reduction <maximumf>, %112, %cst_52 [1] : vector<8x8xf32> to vector<8xf32>
    %114 = vector.shape_cast %113 : vector<8xf32> to vector<8x1xf32>
    %115 = vector.broadcast %114 : vector<8x1xf32> to vector<8x8xf32>
    %116 = arith.subf %112, %115 : vector<8x8xf32>
    %117 = math.exp %116 : vector<8x8xf32>
    %cst_53 = arith.constant dense<0.000000e+00> : vector<8xf32>
    %118 = vector.multi_reduction <add>, %117, %cst_53 [1] : vector<8x8xf32> to vector<8xf32>
    %119 = vector.shape_cast %118 : vector<8xf32> to vector<8x1xf32>
    %120 = vector.broadcast %119 : vector<8x1xf32> to vector<8x8xf32>
    %121 = arith.divf %117, %120 : vector<8x8xf32>
    %cst_54 = arith.constant dense<0.000000e+00> : vector<8x16xf32>
    %122 = tpu.matmul %121, %110, %cst_54 {dimension_numbers = #tpu.dot_dimension_numbers<[1], [0], [0], [1], [0, 0, 1, 1], [], []>} : vector<8x8xf32>, vector<8x16xf32>, vector<8x16xf32> -> vector<8x16xf32>
    %123 = vector.extract_strided_slice %70 {offsets = [32, 0], sizes = [16, 64], strides = [1, 1]} : vector<64x64xf32> to vector<16x64xf32>
    %cst_55 = arith.constant dense<0.000000e+00> : vector<8x64xf32>
    %124 = tpu.matmul %122, %123, %cst_55 {dimension_numbers = #tpu.dot_dimension_numbers<[1], [0], [0], [1], [0, 0, 1, 1], [], []>} : vector<8x16xf32>, vector<16x64xf32>, vector<8x64xf32> -> vector<8x64xf32>
    %125 = arith.addf %107, %124 : vector<8x64xf32>
    %126 = vector.extract_strided_slice %63 {offsets = [0, 48], sizes = [8, 16], strides = [1, 1]} : vector<8x64xf32> to vector<8x16xf32>
    %127 = vector.extract_strided_slice %67 {offsets = [0, 48], sizes = [8, 16], strides = [1, 1]} : vector<8x64xf32> to vector<8x16xf32>
    %128 = vector.extract_strided_slice %33 {offsets = [0, 48], sizes = [8, 16], strides = [1, 1]} : vector<8x64xf32> to vector<8x16xf32>
    %cst_56 = arith.constant dense<0.000000e+00> : vector<8x8xf32>
    %129 = tpu.matmul %126, %127, %cst_56 {dimension_numbers = #tpu.dot_dimension_numbers<[1], [1], [0], [0], [0, 0, 1, 0], [], []>} : vector<8x16xf32>, vector<8x16xf32>, vector<8x8xf32> -> vector<8x8xf32>
    %130 = arith.addf %129, %69 : vector<8x8xf32>
    %cst_57 = arith.constant dense<0xFF800000> : vector<8xf32>
    %131 = vector.multi_reduction <maximumf>, %130, %cst_57 [1] : vector<8x8xf32> to vector<8xf32>
    %132 = vector.shape_cast %131 : vector<8xf32> to vector<8x1xf32>
    %133 = vector.broadcast %132 : vector<8x1xf32> to vector<8x8xf32>
    %134 = arith.subf %130, %133 : vector<8x8xf32>
    %135 = math.exp %134 : vector<8x8xf32>
    %cst_58 = arith.constant dense<0.000000e+00> : vector<8xf32>
    %136 = vector.multi_reduction <add>, %135, %cst_58 [1] : vector<8x8xf32> to vector<8xf32>
    %137 = vector.shape_cast %136 : vector<8xf32> to vector<8x1xf32>
    %138 = vector.broadcast %137 : vector<8x1xf32> to vector<8x8xf32>
    %139 = arith.divf %135, %138 : vector<8x8xf32>
    %cst_59 = arith.constant dense<0.000000e+00> : vector<8x16xf32>
    %140 = tpu.matmul %139, %128, %cst_59 {dimension_numbers = #tpu.dot_dimension_numbers<[1], [0], [0], [1], [0, 0, 1, 1], [], []>} : vector<8x8xf32>, vector<8x16xf32>, vector<8x16xf32> -> vector<8x16xf32>
    %141 = vector.extract_strided_slice %70 {offsets = [48, 0], sizes = [16, 64], strides = [1, 1]} : vector<64x64xf32> to vector<16x64xf32>
    %cst_60 = arith.constant dense<0.000000e+00> : vector<8x64xf32>
    %142 = tpu.matmul %140, %141, %cst_60 {dimension_numbers = #tpu.dot_dimension_numbers<[1], [0], [0], [1], [0, 0, 1, 1], [], []>} : vector<8x16xf32>, vector<16x64xf32>, vector<8x64xf32> -> vector<8x64xf32>
    %143 = arith.addf %125, %142 : vector<8x64xf32>
    %144 = vector.broadcast %6 : vector<1x64xf32> to vector<8x64xf32>
    %145 = arith.addf %143, %144 : vector<8x64xf32>
    %c0_61 = arith.constant 0 : index
    %c0_62 = arith.constant 0 : index
    %c0_63 = arith.constant 0 : index
    %146 = vector.load %arg8[%c0_61, %c0_62, %c0_63] : memref<1x8x64xf32, #tpu.memory_space<vmem>>, vector<1x8x64xf32>
    %147 = vector.shape_cast %146 : vector<1x8x64xf32> to vector<8x64xf32>
    %148 = vector.shape_cast %145 : vector<8x64xf32> to vector<1x8x64xf32>
    tpu.vector_store %arg8[%c0_61, %c0_62, %c0_63], %148 {strides = array<i32>} : memref<1x8x64xf32, #tpu.memory_space<vmem>>, vector<1x8x64xf32>,
    return
  }
  func.func @transform_0(%arg0: i32) -> (i32, i32, i32) {
    %c0_i32 = arith.constant 0 : i32
    %c0_i32_0 = arith.constant 0 : i32
    %c0_i32_1 = arith.constant 0 : i32
    return %arg0, %c0_i32, %c0_i32_0 : i32, i32, i32
  }
  func.func @transform_1(%arg0: i32) -> (i32, i32, i32) {
    %c0_i32 = arith.constant 0 : i32
    %c0_i32_0 = arith.constant 0 : i32
    %c0_i32_1 = arith.constant 0 : i32
    %c0_i32_2 = arith.constant 0 : i32
    return %c0_i32, %c0_i32_0, %c0_i32_1 : i32, i32, i32
  }
  func.func @transform_2(%arg0: i32) -> (i32, i32) {
    %c0_i32 = arith.constant 0 : i32
    %c0_i32_0 = arith.constant 0 : i32
    %c0_i32_1 = arith.constant 0 : i32
    return %c0_i32, %c0_i32_0 : i32, i32
  }
  func.func @transform_3(%arg0: i32) -> (i32, i32) {
    %c0_i32 = arith.constant 0 : i32
    %c0_i32_0 = arith.constant 0 : i32
    %c0_i32_1 = arith.constant 0 : i32
    return %c0_i32, %c0_i32_0 : i32, i32
  }
  func.func @transform_4(%arg0: i32) -> (i32, i32, i32) {
    %c0_i32 = arith.constant 0 : i32
    %c0_i32_0 = arith.constant 0 : i32
    %c0_i32_1 = arith.constant 0 : i32
    %c0_i32_2 = arith.constant 0 : i32
    return %c0_i32, %c0_i32_0, %c0_i32_1 : i32, i32, i32
  }
  func.func @transform_5(%arg0: i32) -> (i32, i32, i32) {
    %c0_i32 = arith.constant 0 : i32
    %c0_i32_0 = arith.constant 0 : i32
    %c0_i32_1 = arith.constant 0 : i32
    %c0_i32_2 = arith.constant 0 : i32
    return %c0_i32, %c0_i32_0, %c0_i32_1 : i32, i32, i32
  }
  func.func @transform_6(%arg0: i32) -> (i32, i32, i32, i32) {
    %c0_i32 = arith.constant 0 : i32
    %c0_i32_0 = arith.constant 0 : i32
    %c0_i32_1 = arith.constant 0 : i32
    %c0_i32_2 = arith.constant 0 : i32
    return %arg0, %c0_i32, %c0_i32_0, %c0_i32_1 : i32, i32, i32, i32
  }
  func.func @transform_7(%arg0: i32) -> (i32, i32, i32) {
    %c0_i32 = arith.constant 0 : i32
    %c0_i32_0 = arith.constant 0 : i32
    %c0_i32_1 = arith.constant 0 : i32
    return %arg0, %c0_i32, %c0_i32_0 : i32, i32, i32
  }
}

</mosaic_0001>

<bundles_post_ra>
// kernel: tpu_custom_call.1
= control target key start
LH: loop header
LB: loop body
LE: loop exit
PB: predicated region body
PF: predicated region fallthrough
CT: control target
= control target key end

     0   :  { %s2114_s0 = inlined_call_operand.hbm [shape: f32[2,8,64], index: 0, kind: input, shape index: {}]   ;;  %s2115_s1 = inlined_call_operand.hbm [shape: f32[3,64,64], index: 1, kind: input, shape index: {}]   ;;  %s2116_s2 = inlined_call_operand.hbm [shape: f32[64,64], index: 2, kind: input, shape index: {}]   ;;  %s2117_s3 = inlined_call_operand.hbm [shape: f32[8,64], index: 3, kind: input, shape index: {}]   ;;  %s2118_s4 = inlined_call_operand.hbm [shape: f32[2,8,64], index: 4, kind: input, shape index: {}]   ;;  %s2119_s5 = inlined_call_operand.hbm [shape: f32[2,64,64], index: 5, kind: input, shape index: {}]   ;;  %s2120_s6 = inlined_call_operand.hbm [shape: f32[2,1,8,8], index: 6, kind: input, shape index: {}]   ;;  %s2121_s7 = inlined_call_operand.hbm [shape: f32[2,8,64], index: 7, kind: output, shape index: {}]  }
   0x1   :  { %2130 = sst [smem:[#allocation24_spill]] %s2114_s0 }
   0x2   :  { %2131 = sst [smem:[#allocation25_spill]] %s2115_s1 }
   0x3   :  { %2132 = sst [smem:[#allocation26_spill]] %s2116_s2 }
   0x4   :  { %2133 = sst [smem:[#allocation27_spill]] %s2117_s3 }
   0x5   :  { %12 = vsyncpa [#allocation3], 0 }
   0x6   :  { %14 = vsyncpa [#allocation3 + $0x1], 0 }
   0x7   :  { %15 = vsyncpa [#allocation6], 0 }
   0x8   :  { %16 = vsyncpa [#allocation9], 0 }
   0x9   :  { %17 = vsyncpa [#allocation12], 0 }
   0xa   :  { %18 = vsyncpa [#allocation4], 0 }
   0xb   :  { %20 = vsyncpa [#allocation4 + $0x1], 0  ;;  %s1798_s24 = smov 0   ;;  %s1800_s25 = smov 0  }
   0xc   :  { %s1802_s26 = smov 0   ;;  %s1804_s27 = smov 0  }
   0xd LB: > { %2134 = sst [smem:[#allocation21_spill]] %s1742_s26  ;;  %s1822_s8 = sadd.s32 4294967295, %s1746_s27   ;;  %s1746_s27 = sphi %s1804_s27, %s2157_s27   ;;  %s1742_s26 = sphi %s1802_s26, %s2159_s26   ;;  %s1738_s25 = sphi %s1800_s25, %s2161_s25   ;;  %s1734_s24 = sphi %s1798_s24, %s2160_s24  }
   0xe   : > { %s2135_s1 = sld [smem:[#allocation25_spill]]  ;;  %p1278_p0 = scmp.ge.s32.totalorder %s1746_s27, 1 }
   0xf   : > { %p2129_p1 = scmp.eq.s32.totalorder %s1822_s8, 0  ;;  %p214_p2 = scmp.lt.s32.totalorder %s1746_s27, 3 }
  0x10   : > { %s1748_s10 = smov [#allocation5]   ;;  %s2137_s3 = sld [smem:[#allocation27_spill]] }
  0x11   : > { %p1827_p3 = pnand %p1278_p0, %p214_p2  ;;  %s227_s11 = sshll.u32 %s1748_s10, 4  ;;  %s228_s11 = int_to_ptr.vmem [resolvable:$true] %s227_s11 }
  0x12   : > { %s1749_s16 = smov [#allocation8]   ;;  %s2122_s18 = smov 128  }
  0x13   : > { %p1353_p4 = pneg %p1827_p3  ;;  %s256_s17 = sshll.u32 %s1749_s16, 4  ;;  %s257_s17 = int_to_ptr.vmem [resolvable:$true] %s256_s17 }
  0x14   : > { %s225_s30 = sshll.u32 %s2135_s1, 4  ;;  %s2124_s19 = smov 8   ;;  %s226_s30 = int_to_ptr.hbm [resolvable:$true] %s225_s30 }
  0x15   : > { %p1839_p6 = pnand %p1353_p4, %p2129_p1  ;;  %s1277_s20 = sadd.s32 4294967294, %s1746_s27  }
  0x16   : > { %s254_s14 = sshll.u32 %s2137_s3, 4  ;;  %s1852_s21 = sadd.s32 1, %s1746_s27   ;;  %s255_s14 = int_to_ptr.hbm [resolvable:$true] %s254_s14 }
  0x17   : > { %1356 = dma.hbm_to_vmem [thread:$0]  (!%p1839_p6), %s226_s30, 3072, %s228_s11, [#allocation6], %s2122_s18, %s2122_s18, %s2124_s19  }
  0x18   : > { %1362 = dma.hbm_to_vmem [thread:$0]  (!%p1839_p6), %s255_s14, 128, %s257_s17, [#allocation9]  }
  0x19   : > { %2139 = sst [smem:[#allocation22_spill]] %s1852_s21  ;;  %s30_s22 = ssub.s32 %s1746_s27, %s1852_s21 }
  0x1a   : > { %s33_s23 = sadd.s32 1, %s1742_s26  ;;  %p31_p7 = scmp.eq.s32.totalorder %s30_s22, 0 }
  0x1b   : > { %p40_p8 = scmp.ne.s32.totalorder %s1742_s26, %s1738_s25  ;;  %p41_p9 = scmp.eq.s32.totalorder %s1746_s27, 0 }
  0x1c   : > { %p46_p10 = scmp.ne.s32.totalorder %s1738_s25, %s1734_s24  ;;  %p201_p13 = scmp.eq.s32.totalorder %s1822_s8, 1 }
  0x1d   : > { %s1863_s28 = scalar_select %p31_p7, %s1742_s26, %s33_s23  }
  0x1e   : > { %p1865_p11 = por %p41_p9, %p40_p8  ;;  %p1871_p12 = por %p2129_p1, %p46_p10 }
  0x1f   : > { %2140 = sst [smem:[#allocation23_spill]] %s1863_s28  ;;  %p207_p0 = scmp.eq.s32.totalorder %s1277_s20, 1 }
  0x20   : > { %p1385_p2 = scmp.lt.s32.totalorder %s1746_s27, 2  ;;  %s295_s10 = sand.u32 1, %s1746_s27  }
  0x21   : > { %p1878_p4 = por %p201_p13, %p40_p8  ;;  %p1882_p7 = por %p207_p0, %p46_p10 }
  0x22   : > { %s297_s13 = sand.u32 1, %s1742_s26   ;;  %s1286_s16 = sshll.u32 %s1746_s27, 3 }
  0x23   : > { %s1887_s14 = sshll.u32 %s297_s13, 3  ;;  %s2145_s0 = sld [smem:[#allocation24_spill]] }
  0x24   : > { %s299_s18 = scalar_lea.vmem [#allocation2], %s1887_s14  ;;  %p1898_p8 = pnand %p1385_p2, %p1865_p11 }
  0x25   : > { %s307_s19 = sshll.u32 %s299_s18, 4  ;;  %s1905_s28 = scalar_lea.hbm %s2120_s6, %s1286_s16  ;;  %s308_s19 = int_to_ptr.vmem [resolvable:$true] %s307_s19 }
  0x26   : > { %s2147_s2 = sld [smem:[#allocation26_spill]]  ;;  %s1910_s18 = scalar_lea.sflag [#allocation3], %s295_s10 }
  0x27   : > { %p1518_p10 = pneg %p1898_p8 }
  0x29   : > { %s303_s23 = scalar_lea.hbm %s2145_s0, %s1286_s16  ;;  %s1521_s13 = scalar_lea.hbm %s2145_s0, 16 }
  0x2a   : > { %s305_s20 = sshll.u32 %s303_s23, 4  ;;  %s306_s20 = int_to_ptr.hbm [resolvable:$true] %s305_s20 }
  0x2b   : > { %s1514_s29 = sshra.s32 %s306_s20, 4  ;;  %s1515_s29 = int_to_ptr.hbm [resolvable:$true] %s1514_s29 }
  0x2c   : > { %s239_s23 = sshll.u32 %s2147_s2, 4  ;;  %s1516_s26 = scalar_lea.hbm %s1515_s29, 8  ;;  %s240_s23 = int_to_ptr.hbm [resolvable:$true] %s239_s23 }
  0x2d   : > { %p1517_p9 = scmp.ne.s32.totalorder %s1515_s29, %s1516_s26  ;;  %p1522_p0 = scmp.lt.s32.totalorder %s1515_s29, %s2145_s0 }
  0x2e   : > { %p1523_p2 = scmp.lt.s32.totalorder %s1521_s13, %s1516_s26 }
  0x2f   : > { %p1519_p11 = pnand %p1518_p10, %p1517_p9 }
  0x30   : > { %p1524_p5 = por %p1523_p2, %p1522_p0 }
  0x31   : > { %p1520_p13 = pneg %p1519_p11 }
  0x33   : > { %p1525_p1 = pnand %p1524_p5, %p1520_p13 }
  0x35   : > { %1528 = shalt.err (!%p1525_p1)
}
  0x36   : > { %1372 = dma.hbm_to_vmem [thread:$0]  (!%p1898_p8), %s306_s20, 128, %s308_s19, %s1910_s18  }
  0x37   : > { %s265_s3 = sshll.u32 %s2118_s4, 4  ;;  %s1752_s16 = smov [#allocation7]   ;;  %s266_s3 = int_to_ptr.hbm [resolvable:$true] %s265_s3 }
  0x38   : > { %s241_s2 = sshll.u32 %s1752_s16, 4  ;;  %s2148_s26 = smov 8   ;;  %s242_s2 = int_to_ptr.vmem [resolvable:$true] %s241_s2 }
  0x39   : > { %s2149_s21 = smov 128   ;;  %s1753_s29 = smov [#allocation10]  }
  0x3a   : > { %1359 = dma.hbm_to_vmem [thread:$0]  (!%p1839_p6), %s240_s23, 1024, %s242_s2, [#allocation6], %s2149_s21, %s2149_s21, %s2148_s26  }
  0x3b   : > { %s267_s13 = sshll.u32 %s1753_s29, 4  ;;  %s279_s19 = sshll.u32 %s2119_s5, 4  ;;  %s268_s13 = int_to_ptr.vmem [resolvable:$true] %s267_s13  ;;  %s280_s19 = int_to_ptr.hbm [resolvable:$true] %s279_s19 }
  0x3c   : > { %1365 = dma.hbm_to_vmem [thread:$0]  (!%p1839_p6), %s266_s3, 256, %s268_s13, [#allocation9], %s2149_s21, %s2149_s21, %s2148_s26  }
  0x3d   : > { %s324_s20 = sshll.u32 %s1905_s28, 4  ;;  %s1754_s10 = smov [#allocation11]   ;;  %s325_s20 = int_to_ptr.hbm [resolvable:$true] %s324_s20 }
  0x3e   : > { %s281_s22 = sshll.u32 %s1754_s10, 4  ;;  %s318_s2 = scalar_lea.vmem [#allocation13], %s1887_s14  ;;  %s282_s22 = int_to_ptr.vmem [resolvable:$true] %s281_s22 }
  0x3f   : > { %s326_s23 = sshll.u32 %s318_s2, 4  ;;  %s1634_s0 = sshra.s32 %s325_s20, 4  ;;  %s327_s23 = int_to_ptr.vmem [resolvable:$true] %s326_s23  ;;  %s1635_s0 = int_to_ptr.hbm [resolvable:$true] %s1634_s0 }
  0x40   : > { %1368 = dma.hbm_to_vmem [thread:$0]  (!%p1839_p6), %s280_s19, 2048, %s282_s22, [#allocation12], %s2149_s21, %s2149_s21, %s2148_s26  }
  0x41   : > { %s1636_s16 = scalar_lea.hbm %s1635_s0, 8  ;;  %s1641_s29 = scalar_lea.hbm %s2120_s6, 16 }
  0x42   : > { %p1637_p1 = scmp.ne.s32.totalorder %s1635_s0, %s1636_s16  ;;  %p1642_p11 = scmp.lt.s32.totalorder %s1635_s0, %s2120_s6 }
  0x43   : > { %p1643_p13 = scmp.lt.s32.totalorder %s1641_s29, %s1636_s16 }
  0x44   : > { %p1639_p5 = pnand %p1637_p1, %p1518_p10 }
  0x45   : > { %p1644_p0 = por %p1643_p13, %p1642_p11 }
  0x46   : > { %p1640_p9 = pneg %p1639_p5 }
  0x48   : > { %p1645_p6 = pnand %p1644_p0, %p1640_p9 }
  0x4a   : > { %1648 = shalt.err (!%p1645_p6)
}
  0x4b   : > { %1375 = dma.hbm_to_vmem [thread:$0]  (!%p1898_p8), %s325_s20, 128, %s327_s23, %s1910_s18  }
  0x4c   : > { %335 = sbr.rel (%p1827_p3) target bundleno = 1868 (0x74c), region = 48  ;;  %s337_s15 = sand.u32 (!%p1827_p3), 1, %s1822_s8  }
  0x4d   : > { %s339_s26 = sand.u32 (!%p1827_p3), 1, %s1738_s25   ;;  %s338_s17 = scalar_lea.sflag (!%p1827_p3), [#allocation3], %s337_s15 }
  0x4e   : > { %s1967_s21 = sshll.u32 (!%p1827_p3), %s339_s26, 3 }
  0x4f   : > { %s341_s19 = scalar_lea.vmem (!%p1827_p3), [#allocation2], %s1967_s21 }
  0x51   : > { %1709 = dma.done.wait (%p1871_p12), %s338_s17, 128  }
  0x52   : > { %1711 = vsyncadd (%p1871_p12), %s338_s17, 4294967168  ;;  %p2150_p8 = scmp.eq.s32.totalorder %s1822_s8, 0 }
  0x54   : > { %1713 = dma.done.wait (%p2150_p8), [#allocation6], 4096   ;;  %p2151_p3 = pmov %p2150_p8 }
  0x56   : > { %1715 = vsyncadd (%p2151_p3), [#allocation6], 4294963200  ;;  %p2152_p10 = pmov %p2151_p3 }
  0x57   : > { %p2153_p2 = pmov %p2151_p3 }
  0x58   : > { %1717 = dma.done.wait (%p2152_p10), [#allocation9], 384  }
  0x59   : > { %1719 = vsyncadd (%p2153_p2), [#allocation9], 4294966912  ;;  %p2154_p1 = pmov %p2153_p2 }
  0x5b   : > { %1721 = dma.done.wait (%p2154_p1), [#allocation12], 2048   ;;  %p2155_p5 = pmov %p2154_p1 }
  0x5c   : > { %s376_s1 = scalar_lea.vmem [#allocation13], %s1967_s21 }
  0x5d   : > { %1723 = vsyncadd (%p2155_p5), [#allocation12], 4294965248 }
  0x5e   : > { %1725 = dma.done.wait (%p1871_p12), %s338_s17, 128  }
  0x5f   : > { %1727 = vsyncadd (%p1871_p12), %s338_s17, 4294967168  ;;  %v442_v0 = vld [vmem:[#allocation5 + $0x38] sm:$0xff]  ;;  %v441_v2 = vld [vmem:[#allocation5 + $0x30] sm:$0xff]  ;;  %vm444_vm0 = vcmask 523264   ;;  %vm716_vm7 = vcmask 130048   ;;  %s1755_s9 = smov 96  }
  0x60   : > { %v476_v1 = vld [vmem:[#allocation5 + $0x78] sm:$0xff]  ;;  %456 = vmatpush.msra.mxu0 %v442_v0  ;;  %v475_v3 = vld [vmem:[#allocation5 + $0x70] sm:$0xff]  ;;  %v440_v4 = vld [vmem:[#allocation5 + $0x28] sm:$0xff]  ;;  %s1756_s30 = smov 112   ;;  %s1757_s18 = smov 80   ;;  %vm743_vm8 = vcmask 64512  }
  0x61   : > { %486 = vmatpush.msra.mxu1 %v476_v1  ;;  %v474_v5 = vld [vmem:[#allocation5 + $0x68] sm:$0xff]  ;;  %v439_v6 = vld [vmem:[#allocation5 + $0x20] sm:$0xff]  ;;  %v1991_v8 = vld [vmem:[#allocation11 + $0x78] sm:$0xff]  ;;  %s1324_s20 = sshll.u32 %s1822_s8, 3  ;;  %s412_s23 = scalar_lea.vmem [#allocation14], %s1967_s21 }
  0x62   : > { %457 = vmatpush.msra.mxu0 %v441_v2  ;;  %v473_v7 = vld [vmem:[#allocation5 + $0x60] sm:$0xff]  ;;  %v438_v9 = vld [vmem:[#allocation5 + $0x18] sm:$0xff]  ;;  %539 = vmatpush.msra.mxu3 %v1991_v8  ;;  %v1994_v11 = vld [vmem:[#allocation11 + $0x70] sm:$0xff]  ;;  %s1134_s2 = scalar_lea.hbm %s2121_s7, %s1324_s20  ;;  %s1136_s0 = sshll.u32 %s412_s23, 4  ;;  %s1137_s0 = int_to_ptr.vmem [resolvable:$true] %s1136_s0 }
  0x63   : > { %487 = vmatpush.msra.mxu1 %v475_v3  ;;  %v472_v10 = vld [vmem:[#allocation5 + $0x58] sm:$0xff]  ;;  %v1996_v12 = vld [vmem:[#allocation11 + $0x68] sm:$0xff]  ;;  %v437_v13 = vld [vmem:[#allocation5 + $0x10] sm:$0xff]  ;;  %s1138_s16 = sshll.u32 %s1134_s2, 4  ;;  %s1124_s8 = scalar_lea.sflag [#allocation4], %s339_s26  ;;  %s1139_s16 = int_to_ptr.hbm [resolvable:$true] %s1138_s16 }
  0x64   : > { %458 = vmatpush.msra.mxu0 %v440_v4  ;;  %v471_v14 = vld [vmem:[#allocation5 + $0x50] sm:$0xff]  ;;  %540 = vmatpush.msra.mxu3 %v1994_v11  ;;  %v431_v15 = vld [vmem:[#allocation11 + $0x60] sm:$0xff]  ;;  %v436_v16 = vld [vmem:[#allocation5 + $0x8] sm:$0xff]  ;;  %s1678_s28 = sshra.s32 %s1139_s16, 4  ;;  %s1684_s13 = scalar_lea.hbm %s2121_s7, 16  ;;  %s1679_s28 = int_to_ptr.hbm [resolvable:$true] %s1678_s28 }
  0x65   : > { %488 = vmatpush.msra.mxu1 %v474_v5  ;;  %v470_v17 = vld [vmem:[#allocation5 + $0x48] sm:$0xff]  ;;  %v430_v18 = vld [vmem:[#allocation11 + $0x58] sm:$0xff]  ;;  %v435_v19 = vld [vmem:[#allocation5] sm:$0xff]  ;;  %s1680_s3 = scalar_lea.hbm %s1679_s28, 8  ;;  %p1685_p13 = scmp.lt.s32.totalorder %s1679_s28, %s2121_s7 }
  0x66   : > { %459 = vmatpush.msra.mxu0 %v439_v6  ;;  %541 = vmatpush.msra.mxu3 %v1996_v12  ;;  %v469_v20 = vld [vmem:[#allocation5 + $0x40] sm:$0xff]  ;;  %v413_v21 = vld [vmem:[%s341_s19] sm:$0xff]  ;;  %v429_v22 = vld [vmem:[#allocation11 + $0x50] sm:$0xff]  ;;  %p1681_p12 = scmp.ne.s32.totalorder %s1679_s28, %s1680_s3  ;;  %p1686_p0 = scmp.lt.s32.totalorder %s1684_s13, %s1680_s3 }
  0x67   : > { %489 = vmatpush.msra.mxu1 %v473_v7  ;;  %v428_v23 = vld [vmem:[#allocation11 + $0x48] sm:$0xff]  ;;  %v427_v24 = vld [vmem:[#allocation11 + $0x40] sm:$0xff]  ;;  %v505_v26 = vld [vmem:[#allocation5 + $0xb0] sm:$0xff] }
  0x68   : > { %460 = vmatpush.msra.mxu0 %v438_v9  ;;  %542 = vmatpush.msra.mxu3 %v431_v15  ;;  %v506_v25 = vld [vmem:[#allocation5 + $0xb8] sm:$0xff]  ;;  %v504_v27 = vld [vmem:[#allocation5 + $0xa8] sm:$0xff]  ;;  %v503_v28 = vld [vmem:[#allocation5 + $0xa0] sm:$0xff]  ;;  %p1682_p9 = pnand %p1681_p12, %p1878_p4  ;;  %p1687_p6 = por %p1686_p0, %p1685_p13 }
  0x69   : > { %490 = vmatpush.msra.mxu1 %v472_v10  ;;  %516 = vmatpush.msra.mxu2 %v506_v25  ;;  %v502_v29 = vld [vmem:[#allocation5 + $0x98] sm:$0xff]  ;;  %v501_v30 = vld [vmem:[#allocation5 + $0x90] sm:$0xff]  ;;  %v500_v31 = vld [vmem:[#allocation5 + $0x88] sm:$0xff] }
  0x6a   : > { %461 = vmatpush.msra.mxu0 %v437_v13  ;;  %543 = vmatpush.msra.mxu3 %v430_v18  ;;  %v499_v32 = vld [vmem:[#allocation5 + $0x80] sm:$0xff]  ;;  %v425_v49 = vld [vmem:[#allocation11 + $0x38] sm:$0xff]  ;;  %v424_v50 = vld [vmem:[#allocation11 + $0x30] sm:$0xff]  ;;  %p1683_p11 = pneg %p1682_p9 }
  0x6b   : > { %491 = vmatpush.msra.mxu1 %v471_v14  ;;  %517 = vmatpush.msra.mxu2 %v505_v26  ;;  %v2014_v33 = vld [vmem:[#allocation8] sm:$0xff]  ;;  %v422_v52 = vld [vmem:[#allocation11 + $0x20] sm:$0xff]  ;;  %v421_v53 = vld [vmem:[#allocation11 + $0x18] sm:$0xff] }
  0x6c   : > { %462 = vmatpush.msra.mxu0 %v436_v16  ;;  %544 = vmatpush.msra.mxu3 %v429_v22  ;;  %v443_v34 = vperm.slane %v2014_v33, 0  ;;  %v477_v35 = vperm.slane %v2014_v33, 1  ;;  %v507_v40 = vperm.slane %v2014_v33, 2  ;;  %v423_v51 = vld [vmem:[#allocation11 + $0x28] sm:$0xff]  ;;  %v420_v54 = vld [vmem:[#allocation11 + $0x10] sm:$0xff]  ;;  %v418_v56 = vld [vmem:[#allocation11] sm:$0xff]  ;;  %p1688_p8 = pnand %p1687_p6, %p1683_p11 }
  0x6d   : > { %492 = vmatpush.msra.mxu1 %v470_v17  ;;  %518 = vmatpush.msra.mxu2 %v504_v27  ;;  %v419_v55 = vld [vmem:[#allocation11 + $0x8] sm:$0xff]  ;;  %v587_v9 = vperm.slane %v2014_v33, 4  ;;  %v589_v14 = vperm.slane %v2014_v33, 5  ;;  %v652_v16 = vperm.slane %v2014_v33, 7 }
  0x6e   : > { %463 = vmatpush.msra.mxu0 %v435_v19  ;;  %545 = vmatpush.msra.mxu3 %v428_v23 }
  0x6f   : > { %493 = vmatpush.msra.mxu1 %v469_v20  ;;  %1298 = vmatmul.msk.f32.vlgmr.msra.gmra.mxu0 %vm444_vm0, %v413_v21 }
  0x70   : > { %1299 = vmatmul.msk.f32.vlgmr.msra.gmra.mxu1 %vm444_vm0, %v413_v21  ;;  %564 = vmatpush.msrb.mxu0 %v1991_v8 }
  0x71   : > { %602 = vmatpush.msrb.mxu1 %v1991_v8  ;;  %546 = vmatpush.msra.mxu3 %v427_v24 }
  0x72   : > { %565 = vmatpush.msrb.mxu0 %v1994_v11  ;;  %519 = vmatpush.msra.mxu2 %v503_v28 }
  0x73   : > { %603 = vmatpush.msrb.mxu1 %v1994_v11  ;;  %666 = vmatpush.msrb.mxu3 %v425_v49 }
  0x74   : > { %566 = vmatpush.msrb.mxu0 %v1996_v12  ;;  %520 = vmatpush.msra.mxu2 %v502_v29 }
  0x75   : > { %604 = vmatpush.msrb.mxu1 %v1996_v12  ;;  %667 = vmatpush.msrb.mxu3 %v424_v50 }
  0x76   : > { %567 = vmatpush.msrb.mxu0 %v431_v15  ;;  %521 = vmatpush.msra.mxu2 %v501_v30 }
  0x77   : > { %605 = vmatpush.msrb.mxu1 %v431_v15  ;;  %668 = vmatpush.msrb.mxu3 %v423_v51 }
  0x78   : > { %568 = vmatpush.msrb.mxu0 %v430_v18  ;;  %522 = vmatpush.msra.mxu2 %v500_v31 }
  0x79   : > { %606 = vmatpush.msrb.mxu1 %v430_v18  ;;  %669 = vmatpush.msrb.mxu3 %v422_v52 }
  0x7a   : > { %569 = vmatpush.msrb.mxu0 %v429_v22  ;;  %523 = vmatpush.msra.mxu2 %v499_v32 }
  0x7b   : > { %607 = vmatpush.msrb.mxu1 %v429_v22  ;;  %1300 = vmatmul.msk.f32.vlgmr.msra.gmra.mxu2 %vm444_vm0, %v413_v21  ;;  %v415_v21 = vld [vmem:[#allocation10] sm:$0xff] }
  0x7c   : > { %570 = vmatpush.msrb.mxu0 %v428_v23  ;;  %627 = vmatpush.msrb.mxu2 %v1991_v8 }
  0x7d   : > { %608 = vmatpush.msrb.mxu1 %v428_v23  ;;  %670 = vmatpush.msrb.mxu3 %v421_v53 }
  0x7e   : > { %571 = vmatpush.msrb.mxu0 %v427_v24  ;;  %628 = vmatpush.msrb.mxu2 %v1994_v11  ;;  %v650_v11 = vperm.slane %v2014_v33, 6 }
  0x7f   : > { %609 = vmatpush.msrb.mxu1 %v427_v24  ;;  %671 = vmatpush.msrb.mxu3 %v420_v54 }
  0x80   : > { %629 = vmatpush.msrb.mxu2 %v1996_v12  ;;  %693 = vmatpush.msra.mxu0 %v425_v49 }
  0x81   : > { %672 = vmatpush.msrb.mxu3 %v419_v55 }
  0x82   : > { %630 = vmatpush.msrb.mxu2 %v431_v15  ;;  %694 = vmatpush.msra.mxu0 %v424_v50 }
  0x83   : > { %673 = vmatpush.msrb.mxu3 %v418_v56 }
  0x84   : > { %631 = vmatpush.msrb.mxu2 %v430_v18  ;;  %695 = vmatpush.msra.mxu0 %v423_v51 }
  0x86   : > { %632 = vmatpush.msrb.mxu2 %v429_v22  ;;  %696 = vmatpush.msra.mxu0 %v422_v52  ;;  %v417_v22 = vld [vmem:[#allocation10 + $0x8] sm:$0xff] }
  0x88   : > { %633 = vmatpush.msrb.mxu2 %v428_v23  ;;  %697 = vmatpush.msra.mxu0 %v421_v53 }
  0x8a   : > { %634 = vmatpush.msrb.mxu2 %v427_v24  ;;  %698 = vmatpush.msra.mxu0 %v420_v54 }
  0x8c   : > { %699 = vmatpush.msra.mxu0 %v419_v55 }
  0x8e   : > { %700 = vmatpush.msra.mxu0 %v418_v56 }
  0xec   : > { %v465_v36 = vpop.f32.mrf.mxu0 }
  0xed   : > { %v495_v37 = vpop.f32.mrf.mxu1  ;;  %v466_v38 = vadd.f32 %v465_v36, %v443_v34  ;;  %v709_v34 = vld [vmem:[#allocation7 + $0x8] sm:$0xff]  ;;  %v708_v36 = vld [vmem:[#allocation7] sm:$0xff] }
  0xee   : > { %v496_v39 = vadd.f32 %v495_v37, %v477_v35 }
  0xef   : > { %1301 = vmatmul.msk.f32.vlgmr.msra.gmra.mxu3 %vm444_vm0, %v466_v38 }
  0xf0   : > { %1303 = vmatmul.msk.f32.vlgmr.msrb.gmra.mxu1 %vm444_vm0, %v496_v39 }
  0xfe   : > { %v525_v41 = vpop.f32.mrf.mxu2 }
  0xff   : > { %v2021_v42 = vadd.f32 %v525_v41, %v507_v40 }
 0x101   : > { %786 = vmatpush.msra.mxu2 %v2021_v42 }
 0x16d   : > { %v611_v43 = vpop.f32.mrf.mxu1 }
 0x16e   : > { %v614_v44 = vsub.f32 %v496_v39, %v611_v43  ;;  %v707_v39 = vld [vmem:[%s376_s1] sm:$0xff] }
 0x170   : > { %v615_v45 = vmul.f32 %v614_v44, %v614_v44 }
 0x172   : > { %1304 = vmatmul.msk.f32.vlgmr.msrb.gmra.mxu2 %vm444_vm0, %v615_v45  ;;  %v548_v46 = vpop.f32.mrf.mxu3 }
 0x173   : > { %v551_v47 = vsub.f32 %v466_v38, %v548_v46 }
 0x175   : > { %v552_v48 = vmul.f32 %v551_v47, %v551_v47 }
 0x177   : > { %1302 = vmatmul.msk.f32.vlgmr.msrb.gmra.mxu0 %vm444_vm0, %v552_v48 }
 0x1f4   : > { %v573_v57 = vpop.f32.mrf.mxu0 }
 0x1f5   : > { %v636_v58 = vpop.f32.mrf.mxu2  ;;  %v574_v59 = vadd.f32 1e-05, %v573_v57 }
 0x1f6   : > { %v637_v60 = vadd.f32 1e-05, %v636_v58 }
 0x1f7   : > { %1434 = vrsqrt.f32 %v574_v59  ;;  %vm582_vm3 = vweird.f32 %v574_v59 }
 0x1f8   : > { %1436 = vrsqrt.f32 %v637_v60  ;;  %vm645_vm5 = vweird.f32 %v637_v60 }
 0x1fd   : > { %v1435_v61 = vpop.eup %1434 }
 0x1fe   : > { %v1437_v62 = vpop.eup %1436  ;;  %v577_v63 = vmul.f32 %v1435_v61, %v574_v59  ;;  %vm583_vm1 = vweird.f32 %v1435_v61 }
 0x1ff   : > { %v640_v0 = vmul.f32 %v1437_v62, %v637_v60  ;;  %vm646_vm2 = vweird.f32 %v1437_v62  ;;  %vm584_vm4 = vmor %vm582_vm3, %vm583_vm1 }
 0x200   : > { %v578_v1 = vmul.f32 %v1435_v61, %v577_v63  ;;  %vm647_vm6 = vmor %vm645_vm5, %vm646_vm2 }
 0x201   : > { %v641_v2 = vmul.f32 %v1437_v62, %v640_v0 }
 0x202   : > { %v579_v3 = vmul.f32 0.5, %v578_v1 }
 0x203   : > { %v642_v4 = vmul.f32 0.5, %v641_v2 }
 0x204   : > { %v580_v5 = vsub.f32 1.5, %v579_v3 }
 0x205   : > { %v643_v6 = vsub.f32 1.5, %v642_v4 }
 0x206   : > { %v581_v7 = vmul.f32 %v1435_v61, %v580_v5 }
 0x207   : > { %v644_v8 = vmul.f32 %v1437_v62, %v643_v6 }
 0x208   : > { %v585_v10 = vsel %vm584_vm4, %v1435_v61, %v581_v7 }
 0x209   : > { %v586_v12 = vmul.f32 %v585_v10, %v551_v47  ;;  %v648_v13 = vsel %vm647_vm6, %v1437_v62, %v644_v8 }
 0x20a   : > { %v649_v15 = vmul.f32 %v648_v13, %v614_v44 }
 0x20b   : > { %v588_v17 = vmul.f32 %v587_v9, %v586_v12 }
 0x20c   : > { %v651_v18 = vmul.f32 %v650_v11, %v649_v15 }
 0x20d   : > { %v590_v19 = vadd.f32 %v589_v14, %v588_v17 }
 0x20e   : > { %v653_v20 = vadd.f32 %v652_v16, %v651_v18 }
 0x20f   : > { %1305 = vmatmul.msk.f32.vlgmr.msrb.gmra.mxu3 %vm444_vm0, %v590_v19  ;;  %v654_v28 = vmul.f32 %v590_v19, %v415_v21 }
 0x210   : > { %1306 = vmatmul.msk.f32.vlgmr.msra.gmra.mxu0 %vm444_vm0, %v653_v20  ;;  %v681_v24 = vmul.f32 %v653_v20, %v415_v21 }
 0x28d   : > { %v702_v23 = vpop.f32.mrf.mxu0 }
 0x28e   : > { %v705_v25 = vmul.f32 %v702_v23, %v417_v22 }
 0x290   : > { %v706_v26 = vadd.f32 %v705_v25, %v681_v24 }
 0x292   : > { %918 = vrot.lane.b32.xlu2 %v706_v26, %s1755_s9  ;;  %793 = vrot.lane.b32.xlu1 %v706_v26, %s1756_s30  ;;  %v675_v27 = vpop.f32.mrf.mxu3 }
 0x293   : > { %1307 = vmatpush.xpose.msk.msra.mxu1 %vm716_vm7, %v706_v26  ;;  %v678_v29 = vmul.f32 %v675_v27, %v417_v22 }
 0x295   : > { %v679_v30 = vadd.f32 %v678_v29, %v654_v28 }
 0x297   : > { %v680_v31 = vmul.f32 0.25, %v679_v30 }
 0x299   : > { %1308 = vmatmul.msk.f32.vlgmr.msra.gmra.mxu1 %vm716_vm7, %v680_v31 }
 0x29a   : > { %1020 = vrot.lane.b32.xlu2 %v706_v26, %s1757_s18  ;;  %791 = vrot.lane.b32.xlu1 %v680_v31, %s1756_s30 }
 0x2a2   : > { %1018 = vrot.lane.b32.xlu1 %v680_v31, %s1757_s18 }
 0x2ec   : > { %v919_v32 = vpop.permute.xlu2 %918 }
 0x2ed   : > { %1315 = vmatpush.xpose.msk.msrb.mxu0 %vm716_vm7, %v919_v32 }
 0x2f4   : > { %v1021_v38 = vpop.permute.xlu2 %1020 }
 0x304   : > { %v794_v35 = vpop.permute.xlu1 %793 }
 0x305   : > { %1310 = vmatpush.xpose.msk.msra.mxu3 %vm716_vm7, %v794_v35 }
 0x309   : > { %910 = vmatpush.msrb.mxu3 %v709_v34 }
 0x30b   : > { %911 = vmatpush.msrb.mxu3 %v708_v36 }
 0x30c   : > { %v792_v37 = vpop.permute.xlu1 %791 }
 0x30d   : > { %1311 = vmatmul.msk.f32.vlgmr.msra.gmra.mxu3 %vm716_vm7, %v792_v37 }
 0x30e   : > { %1319 = vmatpush.xpose.msk.msra.mxu3 %vm716_vm7, %v1021_v38  ;;  %v711_v38 = vld [vmem:[#allocation7 + $0x18] sm:$0xff] }
 0x30f   : > { %887 = vmatpush.msrb.mxu2 %v711_v38 }
 0x314   : > { %v1019_v10 = vpop.permute.xlu1 %1018 }
 0x316   : > { %v740_v40 = vpop.f32.mrf.mxu1 }
 0x317   : > { %v741_v41 = vadd.f32 %v740_v40, %v707_v39 }
 0x319   : > { %v744_v43 = vsel %vm743_vm8, %v741_v41, -inf }
 0x31a   : > { %745 = vmax.xlane.f32.xlu0 %v744_v43  ;;  %v710_v43 = vld [vmem:[#allocation7 + $0x10] sm:$0xff] }
 0x31b   : > { %888 = vmatpush.msrb.mxu2 %v710_v43 }
 0x38d   : > { %v746_v44 = vpop.xlane.xlu0 %745 }
 0x38e   : > { %v747_v45 = vsub.f32 %v741_v41, %v746_v44 }
 0x390   : > { %v748_v46 = vmul.f32 1.442695, %v747_v45  ;;  %v816_v47 = vpop.f32.mrf.mxu3 }
 0x391   : > { %v817_v48 = vadd.f32 %v816_v47, %v707_v39 }
 0x392   : > { %1438 = vpow2.f32 %v748_v46 }
 0x393   : > { %v819_v49 = vsel %vm743_vm8, %v817_v48, -inf }
 0x394   : > { %820 = vmax.xlane.f32.xlu2 %v819_v49 }
 0x398   : > { %v1439_v50 = vpop.eup %1438 }
 0x399   : > { %v750_v51 = vsel %vm743_vm8, %v1439_v50, 0.0 }
 0x39a   : > { %751 = vadd.xlane.f32.xlu0 %v750_v51 }
 0x3ae   : > { %916 = vrot.lane.b32.xlu0 %v680_v31, %s1755_s9 }
 0x407   : > { %v821_v52 = vpop.xlane.xlu2 %820 }
 0x408   : > { %v822_v53 = vsub.f32 %v817_v48, %v821_v52 }
 0x40a   : > { %v823_v54 = vmul.f32 1.442695, %v822_v53 }
 0x40c   : > { %1440 = vpow2.f32 %v823_v54 }
 0x40d   : > { %v752_v55 = vpop.xlane.xlu0 %751 }
 0x40e   : > { %1442 = vrcp.f32 %v752_v55  ;;  %v764_v61 = vand.u32 2147483648, %v752_v55  ;;  %v762_v63 = vand.u32 2147483647, %v752_v55  ;;  %vm758_vm10 = vweird.f32 %v752_v55 }
 0x410   : > { %v765_v1 = vor.u32 1.1754944e-38, %v764_v61  ;;  %vm763_vm12 = vcmp.eq.f32.partialorder %v762_v63, 8.507059e+37 }
 0x412   : > { %v1441_v56 = vpop.eup %1440 }
 0x413   : > { %v825_v57 = vsel %vm743_vm8, %v1441_v56, 0.0 }
 0x414   : > { %v1443_v58 = vpop.eup %1442  ;;  %826 = vadd.xlane.f32.xlu2 %v825_v57 }
 0x415   : > { %v754_v59 = vmul.f32 %v1443_v58, %v752_v55  ;;  %vm759_vm9 = vweird.f32 %v1443_v58 }
 0x416   : > { %vm760_vm11 = vmor %vm758_vm10, %vm759_vm9 }
 0x417   : > { %v755_v60 = vsub.f32 1.0, %v754_v59 }
 0x419   : > { %v756_v62 = vmul.f32 %v1443_v58, %v755_v60 }
 0x41b   : > { %v757_v0 = vadd.f32 %v1443_v58, %v756_v62 }
 0x41d   : > { %v761_v2 = vsel %vm760_vm11, %v1443_v58, %v757_v0 }
 0x41e   : > { %v766_v3 = vsel %vm763_vm12, %v765_v1, %v761_v2 }
 0x41f   : > { %v767_v4 = vmul.f32 %v1439_v50, %v766_v3 }
 0x420   : > { %v917_v5 = vpop.permute.xlu0 %916 }
 0x421   : > { %1309 = vmatmul.msk.f32.vlgmr.msra.gmra.mxu2 %vm743_vm8, %v767_v4  ;;  %1316 = vmatmul.msk.f32.vlgmr.msrb.gmra.mxu0 %vm716_vm7, %v917_v5  ;;  %v715_v4 = vld [vmem:[#allocation7 + $0x38] sm:$0xff]  ;;  %v714_v5 = vld [vmem:[#allocation7 + $0x30] sm:$0xff] }
 0x487   : > { %v827_v20 = vpop.xlane.xlu2 %826 }
 0x488   : > { %v839_v26 = vand.u32 2147483648, %v827_v20  ;;  %vm833_vm14 = vweird.f32 %v827_v20  ;;  %v837_v27 = vand.u32 2147483647, %v827_v20 }
 0x48a   : > { %v840_v30 = vor.u32 1.1754944e-38, %v839_v26  ;;  %vm838_vm1 = vcmp.eq.f32.partialorder %v837_v27, 8.507059e+37 }
 0x49e   : > { %v941_v6 = vpop.f32.mrf.mxu0 }
 0x49f   : > { %v942_v7 = vadd.f32 %v941_v6, %v707_v39  ;;  %v713_v6 = vld [vmem:[#allocation7 + $0x28] sm:$0xff] }
 0x4a0   : > { %1011 = vmatpush.msra.mxu2 %v713_v6 }
 0x4a1   : > { %v944_v8 = vsel %vm743_vm8, %v942_v7, -inf }
 0x4a2   : > { %945 = vmax.xlane.f32.xlu1 %v944_v8 }
 0x4a4   : > { %v788_v9 = vpop.f32.mrf.mxu2 }
 0x4a5   : > { %1314 = vmatmul.msk.f32.vlgmr.msrb.gmra.mxu3 %vm716_vm7, %v788_v9 }
 0x4ad   : > { %1320 = vmatmul.msk.f32.vlgmr.msra.gmra.mxu3 %vm716_vm7, %v1019_v10 }
 0x515   : > { %v946_v11 = vpop.xlane.xlu1 %945 }
 0x516   : > { %v947_v12 = vsub.f32 %v942_v7, %v946_v11  ;;  %v712_v7 = vld [vmem:[#allocation7 + $0x20] sm:$0xff] }
 0x517   : > { %1012 = vmatpush.msra.mxu2 %v712_v7 }
 0x518   : > { %v948_v13 = vmul.f32 1.442695, %v947_v12 }
 0x51a   : > { %1444 = vpow2.f32 %v948_v13 }
 0x51b   : > { %1446 = vrcp.f32 %v827_v20 }
 0x520   : > { %v2055_v14 = vpop.eup %1444 }
 0x521   : > { %v950_v15 = vsel %vm743_vm8, %v2055_v14, 0.0  ;;  %v1447_v21 = vpop.eup %1446 }
 0x522   : > { %951 = vadd.xlane.f32.xlu2 %v950_v15  ;;  %v829_v22 = vmul.f32 %v1447_v21, %v827_v20  ;;  %vm834_vm13 = vweird.f32 %v1447_v21 }
 0x523   : > { %vm835_vm15 = vmor %vm833_vm14, %vm834_vm13 }
 0x524   : > { %v830_v23 = vsub.f32 1.0, %v829_v22 }
 0x526   : > { %v831_v24 = vmul.f32 %v1447_v21, %v830_v23 }
 0x528   : > { %v2059_v16 = vpop.f32.mrf.mxu3  ;;  %v832_v25 = vadd.f32 %v1447_v21, %v831_v24 }
 0x52a   : > { %v836_v29 = vsel %vm835_vm15, %v1447_v21, %v832_v25 }
 0x52b   : > { %v841_v31 = vsel %vm838_vm1, %v840_v30, %v836_v29 }
 0x52c   : > { %v842_v34 = vmul.f32 %v1441_v56, %v841_v31 }
 0x530   : > { %v1043_v17 = vpop.f32.mrf.mxu3 }
 0x531   : > { %v1044_v18 = vadd.f32 %v1043_v17, %v707_v39 }
 0x533   : > { %v1046_v19 = vsel %vm743_vm8, %v1044_v18, -inf }
 0x534   : > { %1047 = vmax.xlane.f32.xlu0 %v1046_v19 }
 0x53a   : > { %844 = vrot.lane.b32.xlu2 %v2021_v42, %s1756_s30 }
 0x548   : > { %1070 = vrot.lane.b32.xlu0 %v2021_v42, %s1757_s18 }
 0x595   : > { %v952_v28 = vpop.xlane.xlu2 %951 }
 0x596   : > { %v964_v57 = vand.u32 2147483648, %v952_v28  ;;  %vm958_vm6 = vweird.f32 %v952_v28  ;;  %v962_v59 = vand.u32 2147483647, %v952_v28 }
 0x598   : > { %v965_v0 = vor.u32 1.1754944e-38, %v964_v57  ;;  %vm963_vm11 = vcmp.eq.f32.partialorder %v962_v59, 8.507059e+37 }
 0x59d   : > { %v845_v32 = vpop.permute.xlu2 %844 }
 0x59e   : > { %865 = vmatpush.msrb.mxu1 %v845_v32 }
 0x59f   : > { %1312 = vmatmul.msk.f32.vlgmr.msrb.gmra.mxu1 %vm743_vm8, %v842_v34 }
 0x5a7   : > { %v1048_v35 = vpop.xlane.xlu0 %1047 }
 0x5a8   : > { %v1049_v36 = vsub.f32 %v1044_v18, %v1048_v35 }
 0x5aa   : > { %v1050_v37 = vmul.f32 1.442695, %v1049_v36 }
 0x5ac   : > { %1448 = vpow2.f32 %v1050_v37 }
 0x5ad   : > { %1450 = vrcp.f32 %v952_v28 }
 0x5b2   : > { %v1449_v39 = vpop.eup %1448 }
 0x5b3   : > { %v1052_v40 = vsel %vm743_vm8, %v1449_v39, 0.0  ;;  %v1451_v45 = vpop.eup %1450 }
 0x5b4   : > { %1053 = vadd.xlane.f32.xlu1 %v1052_v40  ;;  %v954_v47 = vmul.f32 %v1451_v45, %v952_v28  ;;  %vm959_vm3 = vweird.f32 %v1451_v45 }
 0x5b5   : > { %vm960_vm10 = vmor %vm958_vm6, %vm959_vm3 }
 0x5b6   : > { %v955_v48 = vsub.f32 1.0, %v954_v47 }
 0x5b8   : > { %v956_v51 = vmul.f32 %v1451_v45, %v955_v48 }
 0x5ba   : > { %v1071_v41 = vpop.permute.xlu0 %1070 }
 0x5bb   : > { %1091 = vmatpush.msra.mxu0 %v1071_v41 }
 0x5cd   : > { %968 = vrot.lane.b32.xlu1 %v2021_v42, %s1755_s9  ;;  %v957_v42 = vadd.f32 %v1451_v45, %v956_v51 }
 0x5cf   : > { %v961_v62 = vsel %vm960_vm10, %v1451_v45, %v957_v42 }
 0x5d0   : > { %v966_v1 = vsel %vm963_vm11, %v965_v0, %v961_v62 }
 0x5d1   : > { %v967_v3 = vmul.f32 %v2055_v14, %v966_v1  ;;  %v1120_v14 = vperm.slane %v2014_v33, 3 }
 0x61c   : > { %v867_v44 = vpop.f32.mrf.mxu1 }
 0x61d   : > { %1313 = vmatmul.msk.f32.vlgmr.msrb.gmra.mxu2 %vm716_vm7, %v867_v44 }
 0x627   : > { %v1054_v46 = vpop.xlane.xlu1 %1053 }
 0x628   : > { %1452 = vrcp.f32 %v1054_v46  ;;  %v1066_v53 = vand.u32 2147483648, %v1054_v46  ;;  %v1064_v55 = vand.u32 2147483647, %v1054_v46  ;;  %vm1060_vm4 = vweird.f32 %v1054_v46 }
 0x62a   : > { %v1067_v58 = vor.u32 1.1754944e-38, %v1066_v53  ;;  %vm1065_vm9 = vcmp.eq.f32.partialorder %v1064_v55, 8.507059e+37 }
 0x62e   : > { %v1453_v49 = vpop.eup %1452 }
 0x62f   : > { %v1056_v50 = vmul.f32 %v1453_v49, %v1054_v46  ;;  %vm1061_vm2 = vweird.f32 %v1453_v49 }
 0x630   : > { %vm1062_vm5 = vmor %vm1060_vm4, %vm1061_vm2 }
 0x631   : > { %v1057_v52 = vsub.f32 1.0, %v1056_v50 }
 0x633   : > { %v1058_v54 = vmul.f32 %v1453_v49, %v1057_v52 }
 0x635   : > { %v1059_v56 = vadd.f32 %v1453_v49, %v1058_v54 }
 0x637   : > { %v1063_v60 = vsel %vm1062_vm5, %v1453_v49, %v1059_v56 }
 0x638   : > { %v1068_v61 = vsel %vm1065_vm9, %v1067_v58, %v1063_v60 }
 0x639   : > { %v1069_v63 = vmul.f32 %v1449_v39, %v1068_v61 }
 0x63b   : > { %1321 = vmatmul.msk.f32.vlgmr.msra.gmra.mxu0 %vm743_vm8, %v1069_v63 }
 0x63f   : > { %v969_v2 = vpop.permute.xlu1 %968 }
 0x640   : > { %989 = vmatpush.msra.mxu1 %v969_v2 }
 0x641   : > { %1317 = vmatmul.msk.f32.vlgmr.msra.gmra.mxu1 %vm743_vm8, %v967_v3 }
 0x642   : > { %1113 = vmatpush.msrb.mxu1 %v715_v4 }
 0x644   : > { %1114 = vmatpush.msrb.mxu1 %v714_v5 }
 0x6a0   : > { %v890_v10 = vpop.f32.mrf.mxu2 }
 0x6a1   : > { %v914_v11 = vadd.f32 %v2059_v16, %v890_v10 }
 0x6b8   : > { %v1093_v8 = vpop.f32.mrf.mxu0 }
 0x6b9   : > { %1322 = vmatmul.msk.f32.vlgmr.msrb.gmra.mxu1 %vm716_vm7, %v1093_v8 }
 0x6be   : > { %v991_v9 = vpop.f32.mrf.mxu1 }
 0x6bf   : > { %1318 = vmatmul.msk.f32.vlgmr.msra.gmra.mxu2 %vm716_vm7, %v991_v9 }
 0x736   : > { %v1116_v15 = vpop.f32.mrf.mxu1 }
 0x742   : > { %v1014_v12 = vpop.f32.mrf.mxu2 }
 0x743   : > { %v1017_v13 = vadd.f32 %v1014_v12, %v914_v11 }
 0x745   : > { %v1119_v17 = vadd.f32 %v1116_v15, %v1017_v13 }
 0x747   : > { %v1121_v18 = vadd.f32 %v1120_v14, %v1119_v17 }
 0x749   : > { %1122 = vst.msk [vmem:[%s412_s23] sm:$0xff] %vm444_vm0, %v1121_v18 }
 0x74a   : > { %1691 = shalt.err (!%p1688_p8)
}
 0x74b   : > { %1351 = dma.vmem_to_hbm [thread:$0]  (%p1878_p4), %s1137_s0, 128, %s1139_s16, %s1124_s8  }
 0x74c PF: > { %s1150_s26 = sand.u32 1, %s1734_s24   ;;  %p2156_p3 = scmp.ge.s32.totalorder %s1746_s27, 2 }
 0x74d   : > { %s1151_s17 = scalar_lea.sflag [#allocation4], %s1150_s26 }
 0x74e   : > { %p1377_p10 = pnand %p2156_p3, %p1882_p7 }
 0x750   : > { %p1378_p2 = pneg %p1377_p10 }
 0x752   : > { %1729 = dma.done.wait (%p1378_p2), %s1151_s17, 128  }
 0x753   : > { %1731 = vsyncadd (%p1378_p2), %s1151_s17, 4294967168  ;;  %s2157_s27 = sld [smem:[#allocation22_spill]]  ;;  %s2160_s24 = smov %s1738_s25 }
 0x754   : > { %s2158_s19 = sld [smem:[#allocation21_spill]] }
 0x755   : > { %s2159_s26 = sld [smem:[#allocation23_spill]] }
 0x759   : > { %p23_p1 = scmp.ge.s32.totalorder %s2157_s27, 4  }
 0x75a   : > { %s2161_s25 = smov %s2158_s19 }
 0x75b   :  { %25 = sbr.rel (!%p23_p1) target bundleno = 13 (0xd), region = 128 }
 0x760   :  { %1157 = vsyncpa [#allocation3], 1 }
 0x761   :  { %1159 = vsyncpa [#allocation3 + $0x1], 1 }
 0x762   :  { %1160 = vsyncpa [#allocation6], 1 }
 0x763   :  { %1161 = vsyncpa [#allocation9], 1 }
 0x764   :  { %1162 = vsyncpa [#allocation12], 1 }
 0x765   :  { %1163 = vsyncpa [#allocation4], 1 }
 0x766   :  { %1165 = vsyncpa [#allocation4 + $0x1], 1 }

</bundles_post_ra>
